<compile_context>
chip_gen: v5e
topology: v5e:2x2
jax: 0.10.0
libtpu: 0.0.40
codegen_flags: <defaults>
</compile_context>

<pallas_src>
import functools

import jax
import jax.numpy as jnp
from jax.experimental import pallas as pl
from jax.experimental.pallas import tpu as pltpu


def _round_up(x: int, m: int) -> int:
    return (x + m - 1) // m * m


def _single_buffered_spec(shape, index_map):
    """BlockSpec for a constant-index (VMEM-resident) operand: 1 buffer, not 2."""
    try:
        return pl.BlockSpec(shape, index_map, pipeline_mode=pl.Buffered(1))
    except TypeError:  # older jax without pipeline_mode -> default double buffer
        return pl.BlockSpec(shape, index_map)


# --------------------------------------------------------------------------
# Kernels
# --------------------------------------------------------------------------
def _perceptron_resident_kernel(x_ref, w1_ref, b1_ref, w2_ref, b2_ref, o_ref):
    # layer1: x @ w1 + b1   (MXU, f32 accumulation)
    xv = x_ref[...].astype(w1_ref.dtype)          # bf16-ready cast (no-op for f32)
    h = jnp.dot(xv, w1_ref[...], preferred_element_type=jnp.float32)
    h = h + b1_ref[...]
    # sigmoid(x) = 0.5 * tanh(x/2) + 0.5  -> single EUP transcendental
    h = 0.5 * jnp.tanh(0.5 * h) + 0.5
    # layer2: h @ w2 + b2
    out = jnp.dot(h.astype(w2_ref.dtype), w2_ref[...],
                  preferred_element_type=jnp.float32)
    out = out + b2_ref[...]
    o_ref[...] = out.astype(o_ref.dtype)


def _perceptron_hidden_tiled_kernel(x_ref, w1_ref, b1_ref, w2_ref, b2_ref,
                                    o_ref, acc_ref):
    # grid = (batch_tiles, hidden_tiles); hidden axis is a reduction ("arbitrary").
    k = pl.program_id(1)

    @pl.when(k == 0)
    def _():
        acc_ref[...] = jnp.zeros_like(acc_ref)

    xv = x_ref[...].astype(w1_ref.dtype)
    h = jnp.dot(xv, w1_ref[...], preferred_element_type=jnp.float32)
    h = h + b1_ref[...]
    h = 0.5 * jnp.tanh(0.5 * h) + 0.5
    acc_ref[...] += jnp.dot(h.astype(w2_ref.dtype), w2_ref[...],
                            preferred_element_type=jnp.float32)

    @pl.when(k == pl.num_programs(1) - 1)
    def _():
        o_ref[...] = (acc_ref[...] + b2_ref[...]).astype(o_ref.dtype)


# --------------------------------------------------------------------------
# Wrapper
# --------------------------------------------------------------------------
@functools.partial(jax.jit,
                   static_argnames=("block_batch", "use_bf16", "hidden_block"))
def perceptron_forward(x, w1, b1, w2, b2, *, block_batch=None, use_bf16=False,
                       hidden_block=None):
    batch, in_f = x.shape
    hidden = w1.shape[1]
    out_f = w2.shape[1]

    x_dt = x.dtype
    w_dt = jnp.bfloat16 if use_bf16 else w1.dtype
    out_dt = x_dt

    out_p = _round_up(out_f, 128)          # lane-dense output stores
    hid_p0 = _round_up(hidden, 128)

    x_it = jnp.dtype(x_dt).itemsize
    w_it = jnp.dtype(w_dt).itemsize
    o_it = jnp.dtype(out_dt).itemsize

    # ---- generation-aware VMEM budget ------------------------------------
    try:
        vmem_cap = int(pltpu.get_tpu_info().vmem_capacity_bytes)
    except Exception:
        vmem_cap = 64 * 1024 * 1024        # conservative (v7x per-TC) fallback
    vmem_budget = int(0.8 * vmem_cap)

    # ---- batch tile: target ~2 MiB of streamed x/out per grid step -------
    if block_batch is None:
        row_bytes = in_f * x_it + out_p * o_it
        tm = _round_up(max(512, min(2048, (2 * 1024 * 1024) // max(row_bytes, 1))),
                       128)
    else:
        tm = _round_up(int(block_batch), 8)
    if batch <= tm:
        tm = batch                         # single block == full dim (always legal)

    # ---- VMEM footprint models --------------------------------------------
    def resident_bytes(hp, tm_):
        w = (in_f * hp + hp * out_p) * w_it + (hp + out_p) * 4     # Buffered(1) params
        tiles = 2 * tm_ * in_f * x_it + 2 * tm_ * out_p * o_it     # dbl-buffered x/out
        return w + tiles + tm_ * hp * 4                            # f32 h intermediate

    def tiled_bytes(th, tm_):
        w = 2 * ((in_f * th + th * out_p) * w_it + th * 4) + out_p * 4
        tiles = 2 * tm_ * in_f * x_it + 2 * tm_ * out_p * o_it
        return w + tiles + tm_ * th * 4 + tm_ * out_p * 4          # h + f32 acc

    # ---- resident weights vs hidden-tiled fallback -------------------------
    if hidden_block is not None:
        thid = min(_round_up(int(hidden_block), 128), hid_p0)
    elif resident_bytes(hid_p0, tm) <= vmem_budget:
        thid = None                                                # resident path
    else:
        thid = 128
        for cand in (2048, 1024, 512, 256, 128):
            if cand <= hid_p0 and tiled_bytes(cand, tm) <= vmem_budget:
                thid = cand
                break

    def footprint(tm_):
        return resident_bytes(hid_p0, tm_) if thid is None else tiled_bytes(thid, tm_)

    while tm > 8 and footprint(tm) > vmem_budget:
        tm = max(8, _round_up(tm // 2, 8))
        if batch <= tm:
            tm = batch

    hid_p = hid_p0 if thid is None else _round_up(hidden, thid)

    # ---- pad only the tiny parameter arrays (x / batch dim untouched) -----
    # Padded hidden cols: w1/b1 zero -> h=0 -> sigmoid=0.5 -> zero w2 rows -> 0.
    w1_p = jnp.zeros((in_f, hid_p), w_dt).at[:, :hidden].set(w1.astype(w_dt))
    b1_p = jnp.zeros((1, hid_p), jnp.float32).at[0, :hidden].set(
        b1.astype(jnp.float32))
    w2_p = jnp.zeros((hid_p, out_p), w_dt).at[:hidden, :out_f].set(w2.astype(w_dt))
    b2_p = jnp.zeros((1, out_p), jnp.float32).at[0, :out_f].set(
        b2.astype(jnp.float32))

    nb = pl.cdiv(batch, tm)
    vmem_limit = int(min(vmem_budget, max(32 * 1024 * 1024, 1.5 * footprint(tm))))
    cost = pl.CostEstimate(
        flops=2 * batch * (in_f * hid_p + hid_p * out_p),
        transcendentals=batch * hid_p,
        bytes_accessed=(batch * in_f * x_it
                        + (in_f * hid_p + hid_p * out_p) * w_it
                        + (hid_p + out_p) * 4
                        + batch * out_p * o_it),
    )

    if thid is None:
        # -------- resident-weight path: 1-D grid over batch tiles ----------
        out_padded = pl.pallas_call(
            _perceptron_resident_kernel,
            out_shape=jax.ShapeDtypeStruct((batch, out_p), out_dt),
            grid=(nb,),
            in_specs=[
                pl.BlockSpec((tm, in_f), lambda i: (i, 0)),            # streamed x
                _single_buffered_spec((in_f, hid_p), lambda i: (0, 0)),  # resident w1
                _single_buffered_spec((1, hid_p), lambda i: (0, 0)),     # resident b1
                _single_buffered_spec((hid_p, out_p), lambda i: (0, 0)),  # resident w2
                _single_buffered_spec((1, out_p), lambda i: (0, 0)),      # resident b2
            ],
            out_specs=pl.BlockSpec((tm, out_p), lambda i: (i, 0)),
            compiler_params=pltpu.CompilerParams(
                dimension_semantics=("parallel",),
                vmem_limit_bytes=vmem_limit,
            ),
            cost_estimate=cost,
        )(x, w1_p, b1_p, w2_p, b2_p)
    else:
        # -------- hidden-tiled fallback (large weights / v7x VMEM) ---------
        nk = hid_p // thid
        out_padded = pl.pallas_call(
            _perceptron_hidden_tiled_kernel,
            out_shape=jax.ShapeDtypeStruct((batch, out_p), out_dt),
            grid=(nb, nk),
            in_specs=[
                pl.BlockSpec((tm, in_f), lambda i, k: (i, 0)),       # x (resident per i)
                pl.BlockSpec((in_f, thid), lambda i, k: (0, k)),     # w1 column tile
                pl.BlockSpec((1, thid), lambda i, k: (0, k)),        # b1 tile
                pl.BlockSpec((thid, out_p), lambda i, k: (k, 0)),    # w2 row tile
                _single_buffered_spec((1, out_p), lambda i, k: (0, 0)),  # resident b2
            ],
            out_specs=pl.BlockSpec((tm, out_p), lambda i, k: (i, 0)),
            scratch_shapes=[pltpu.VMEM((tm, out_p), jnp.float32)],
            compiler_params=pltpu.CompilerParams(
                dimension_semantics=("parallel", "arbitrary"),
                vmem_limit_bytes=vmem_limit,
            ),
            cost_estimate=cost,
        )(x, w1_p, b1_p, w2_p, b2_p)

    # slice feature padding only (batch dim never padded)
    return out_padded[:, :out_f]


# --------------------------------------------------------------------------
# Demo / correctness check
# --------------------------------------------------------------------------
if __name__ == "__main__":
    batch, in_features, hidden_features, out_features = 8, 16, 32, 8

    key = jax.random.PRNGKey(0)
    kx, kw1, kb1, kw2, kb2, kw3, kb3, kw4 = jax.random.split(key, 8)

    x = jax.random.normal(kx, (batch, in_features), dtype=jnp.float32)
    w1 = jax.random.normal(kw1, (in_features, hidden_features), dtype=jnp.float32)
    b1 = jax.random.normal(kb1, (hidden_features,), dtype=jnp.float32)
    w2 = jax.random.normal(kw2, (hidden_features, out_features), dtype=jnp.float32)
    b2 = jax.random.normal(kb2, (out_features,), dtype=jnp.float32)

    def ref_fwd(x, w1, b1, w2, b2):
        return jax.nn.sigmoid(x @ w1 + b1) @ w2 + b2

    # 1) f32, resident-weight path
    out = perceptron_forward(x, w1, b1, w2, b2)
    jax.block_until_ready(out)
    ref = ref_fwd(x, w1, b1, w2, b2)
    assert out.shape == (batch, out_features)
    assert jnp.allclose(out, ref, atol=1e-4, rtol=1e-4), (
        float(jnp.max(jnp.abs(out - ref))))

    # 2) hidden-tiled fallback path (forced small hidden tile), f32
    hidden_big = 256
    w1b = jax.random.normal(kw3, (in_features, hidden_big), dtype=jnp.float32)
    b1b = jax.random.normal(kb3, (hidden_big,), dtype=jnp.float32)
    w2b = jax.random.normal(kw4, (hidden_big, out_features), dtype=jnp.float32)
    out_t = perceptron_forward(x, w1b, b1b, w2b, b2, hidden_block=128)
    jax.block_until_ready(out_t)
    ref_t = ref_fwd(x, w1b, b1b, w2b, b2)
    assert jnp.allclose(out_t, ref_t, atol=1e-3, rtol=1e-4), (
        float(jnp.max(jnp.abs(out_t - ref_t))))

    # 3) bf16 compute path (looser tolerance; f32 accumulation + f32 bias/act)
    out_bf = perceptron_forward(x, w1, b1, w2, b2, use_bf16=True)
    jax.block_until_ready(out_bf)
    assert jnp.allclose(out_bf, ref, atol=0.5, rtol=0.1), (
        float(jnp.max(jnp.abs(out_bf - ref))))

    print("KERNEL_OK")
</pallas_src>

<mosaic_0001>
module attributes {stable_mosaic.version = 11 : i64} {
  func.func @_perceptron_resident_kernel(%arg0: i32, %arg1: memref<8x16xf32, #tpu.memory_space<vmem>>, %arg2: memref<16x128xf32, #tpu.memory_space<vmem>>, %arg3: memref<1x128xf32, #tpu.memory_space<vmem>>, %arg4: memref<128x128xf32, #tpu.memory_space<vmem>>, %arg5: memref<1x128xf32, #tpu.memory_space<vmem>>, %arg6: memref<8x128xf32, #tpu.memory_space<vmem>>) attributes {dimension_semantics = [#tpu.dimension_semantics<parallel>], iteration_bounds = array<i64: 1>, scalar_prefetch = 0 : i64, scratch_operands = 0 : i64, tpu.core_type = #tpu.core_type<tc>, window_params = [{transform_indices = @transform_0, window_bounds = array<i64: 8, 16>}, {pipeline_mode = #tpu.pipeline_mode<synchronous>, transform_indices = @transform_1, window_bounds = array<i64: 16, 128>}, {pipeline_mode = #tpu.pipeline_mode<synchronous>, transform_indices = @transform_2, window_bounds = array<i64: 1, 128>}, {pipeline_mode = #tpu.pipeline_mode<synchronous>, transform_indices = @transform_3, window_bounds = array<i64: 128, 128>}, {pipeline_mode = #tpu.pipeline_mode<synchronous>, transform_indices = @transform_4, window_bounds = array<i64: 1, 128>}, {transform_indices = @transform_5, window_bounds = array<i64: 8, 128>}]} {
    %c0 = arith.constant 0 : index
    %c0_0 = arith.constant 0 : index
    %0 = vector.load %arg1[%c0, %c0_0] : memref<8x16xf32, #tpu.memory_space<vmem>>, vector<8x16xf32>
    %c0_1 = arith.constant 0 : index
    %c0_2 = arith.constant 0 : index
    %1 = vector.load %arg2[%c0_1, %c0_2] : memref<16x128xf32, #tpu.memory_space<vmem>>, vector<16x128xf32>
    %cst = arith.constant dense<0.000000e+00> : vector<8x128xf32>
    %2 = tpu.matmul %0, %1, %cst {dimension_numbers = #tpu.dot_dimension_numbers<[1], [0], [0], [1], [0, 0, 1, 1], [], []>} : vector<8x16xf32>, vector<16x128xf32>, vector<8x128xf32> -> vector<8x128xf32>
    %c0_3 = arith.constant 0 : index
    %c0_4 = arith.constant 0 : index
    %3 = vector.load %arg3[%c0_3, %c0_4] : memref<1x128xf32, #tpu.memory_space<vmem>>, vector<1x128xf32>
    %4 = vector.broadcast %3 : vector<1x128xf32> to vector<8x128xf32>
    %5 = arith.addf %2, %4 : vector<8x128xf32>
    %cst_5 = arith.constant 5.000000e-01 : f32
    %6 = vector.broadcast %cst_5 : f32 to vector<8x128xf32>
    %7 = arith.mulf %6, %5 : vector<8x128xf32>
    %8 = math.tanh %7 : vector<8x128xf32>
    %cst_6 = arith.constant 5.000000e-01 : f32
    %9 = vector.broadcast %cst_6 : f32 to vector<8x128xf32>
    %10 = arith.mulf %9, %8 : vector<8x128xf32>
    %cst_7 = arith.constant 5.000000e-01 : f32
    %11 = vector.broadcast %cst_7 : f32 to vector<8x128xf32>
    %12 = arith.addf %10, %11 : vector<8x128xf32>
    %c0_8 = arith.constant 0 : index
    %c0_9 = arith.constant 0 : index
    %13 = vector.load %arg4[%c0_8, %c0_9] : memref<128x128xf32, #tpu.memory_space<vmem>>, vector<128x128xf32>
    %cst_10 = arith.constant dense<0.000000e+00> : vector<8x128xf32>
    %14 = tpu.matmul %12, %13, %cst_10 {dimension_numbers = #tpu.dot_dimension_numbers<[1], [0], [0], [1], [0, 0, 1, 1], [], []>} : vector<8x128xf32>, vector<128x128xf32>, vector<8x128xf32> -> vector<8x128xf32>
    %c0_11 = arith.constant 0 : index
    %c0_12 = arith.constant 0 : index
    %15 = vector.load %arg5[%c0_11, %c0_12] : memref<1x128xf32, #tpu.memory_space<vmem>>, vector<1x128xf32>
    %16 = vector.broadcast %15 : vector<1x128xf32> to vector<8x128xf32>
    %17 = arith.addf %14, %16 : vector<8x128xf32>
    %c0_13 = arith.constant 0 : index
    %c0_14 = arith.constant 0 : index
    %18 = vector.load %arg6[%c0_13, %c0_14] : memref<8x128xf32, #tpu.memory_space<vmem>>, vector<8x128xf32>
    tpu.vector_store %arg6[%c0_13, %c0_14], %17 {strides = array<i32>} : memref<8x128xf32, #tpu.memory_space<vmem>>, vector<8x128xf32>,
    return
  }
  func.func @transform_0(%arg0: i32) -> (i32, i32) {
    %c0_i32 = arith.constant 0 : i32
    %c0_i32_0 = arith.constant 0 : i32
    return %arg0, %c0_i32 : i32, i32
  }
  func.func @transform_1(%arg0: i32) -> (i32, i32) {
    %c0_i32 = arith.constant 0 : i32
    %c0_i32_0 = arith.constant 0 : i32
    %c0_i32_1 = arith.constant 0 : i32
    return %c0_i32, %c0_i32_0 : i32, i32
  }
  func.func @transform_2(%arg0: i32) -> (i32, i32) {
    %c0_i32 = arith.constant 0 : i32
    %c0_i32_0 = arith.constant 0 : i32
    %c0_i32_1 = arith.constant 0 : i32
    return %c0_i32, %c0_i32_0 : i32, i32
  }
  func.func @transform_3(%arg0: i32) -> (i32, i32) {
    %c0_i32 = arith.constant 0 : i32
    %c0_i32_0 = arith.constant 0 : i32
    %c0_i32_1 = arith.constant 0 : i32
    return %c0_i32, %c0_i32_0 : i32, i32
  }
  func.func @transform_4(%arg0: i32) -> (i32, i32) {
    %c0_i32 = arith.constant 0 : i32
    %c0_i32_0 = arith.constant 0 : i32
    %c0_i32_1 = arith.constant 0 : i32
    return %c0_i32, %c0_i32_0 : i32, i32
  }
  func.func @transform_5(%arg0: i32) -> (i32, i32) {
    %c0_i32 = arith.constant 0 : i32
    %c0_i32_0 = arith.constant 0 : i32
    return %arg0, %c0_i32 : i32, i32
  }
}

</mosaic_0001>

<bundles_post_ra>
// kernel: perceptron_forward.1
= control target key start
LH: loop header
LB: loop body
LE: loop exit
PB: predicated region body
PF: predicated region fallthrough
CT: control target
= control target key end

     0   :  { %vm28_vm0 = vcmask 130048   ;;  %s242_s0 = inlined_call_operand.vmem [shape: f32[8,16], index: 0, kind: input, shape index: {}]   ;;  %s243_s1 = inlined_call_operand.vmem [shape: f32[16,128], index: 1, kind: input, shape index: {}]   ;;  %s244_s2 = inlined_call_operand.vmem [shape: f32[1,128], index: 2, kind: input, shape index: {}]   ;;  %s245_s3 = inlined_call_operand.vmem [shape: f32[128,128], index: 3, kind: input, shape index: {}]   ;;  %s246_s4 = inlined_call_operand.vmem [shape: f32[1,128], index: 4, kind: input, shape index: {}]   ;;  %s247_s5 = inlined_call_operand.hbm [shape: f32[8,128], index: 5, kind: output, shape index: {}]  }
   0x1   :  { %v23_v0 = vld [vmem:[%s243_s1 + $0x8] sm:$0xff]  ;;  %v22_v1 = vld [vmem:[%s243_s1] sm:$0xff]  ;;  %v71_v3 = vld [vmem:[%s245_s3 + $0x78] sm:$0xff] }
   0x2   :  { %46 = vmatpush.msra.mxu0 %v23_v0  ;;  %v21_v2 = vld [vmem:[%s242_s0] sm:$0xff]  ;;  %v70_v4 = vld [vmem:[%s245_s3 + $0x70] sm:$0xff]  ;;  %76 = vmatpush.msra.mxu1 %v71_v3  ;;  %v69_v5 = vld [vmem:[%s245_s3 + $0x68] sm:$0xff] }
   0x4   :  { %47 = vmatpush.msra.mxu0 %v22_v1  ;;  %77 = vmatpush.msra.mxu1 %v70_v4 }
   0x5   :  { %113 = vmatmul.msk.f32.vlgmr.msra.gmra.mxu0 %vm28_vm0, %v21_v2 }
   0x6   :  { %10 = vsyncpa [#allocation3], 0  ;;  %v68_v6 = vld [vmem:[%s245_s3 + $0x60] sm:$0xff]  ;;  %78 = vmatpush.msra.mxu1 %v69_v5  ;;  %v67_v7 = vld [vmem:[%s245_s3 + $0x58] sm:$0xff]  ;;  %s145_s6 = smov [#allocation2]   ;;  %s104_s9 = sshll.u32 %s247_s5, 4  ;;  %s105_s9 = int_to_ptr.hbm [resolvable:$true] %s104_s9 }
   0x7   :  { %v66_v8 = vld [vmem:[%s245_s3 + $0x50] sm:$0xff]  ;;  %v65_v9 = vld [vmem:[%s245_s3 + $0x48] sm:$0xff]  ;;  %v64_v10 = vld [vmem:[%s245_s3 + $0x40] sm:$0xff] }
   0x8   :  { %79 = vmatpush.msra.mxu1 %v68_v6  ;;  %v63_v11 = vld [vmem:[%s245_s3 + $0x38] sm:$0xff]  ;;  %v62_v12 = vld [vmem:[%s245_s3 + $0x30] sm:$0xff]  ;;  %v61_v13 = vld [vmem:[%s245_s3 + $0x28] sm:$0xff] }
   0x9   :  { %v60_v14 = vld [vmem:[%s245_s3 + $0x20] sm:$0xff]  ;;  %v59_v15 = vld [vmem:[%s245_s3 + $0x18] sm:$0xff]  ;;  %v58_v16 = vld [vmem:[%s245_s3 + $0x10] sm:$0xff] }
   0xa   :  { %80 = vmatpush.msra.mxu1 %v67_v7  ;;  %v57_v17 = vld [vmem:[%s245_s3 + $0x8] sm:$0xff]  ;;  %v56_v18 = vld [vmem:[%s245_s3] sm:$0xff]  ;;  %s102_s3 = sshll.u32 %s145_s6, 4  ;;  %s103_s3 = int_to_ptr.vmem [resolvable:$true] %s102_s3 }
   0xb   :  { %v115_v19 = vld [vmem:[%s244_s2] ss:$0 sm:$0xff] }
   0xc   :  { %81 = vmatpush.msra.mxu1 %v66_v8  ;;  %v116_v26 = vld [vmem:[%s246_s4] ss:$0 sm:$0xff] }
   0xe   :  { %82 = vmatpush.msra.mxu1 %v65_v9 }
  0x10   :  { %83 = vmatpush.msra.mxu1 %v64_v10 }
  0x12   :  { %84 = vmatpush.msra.mxu1 %v63_v11 }
  0x14   :  { %85 = vmatpush.msra.mxu1 %v62_v12 }
  0x16   :  { %86 = vmatpush.msra.mxu1 %v61_v13 }
  0x18   :  { %87 = vmatpush.msra.mxu1 %v60_v14 }
  0x1a   :  { %88 = vmatpush.msra.mxu1 %v59_v15 }
  0x1c   :  { %89 = vmatpush.msra.mxu1 %v58_v16 }
  0x1e   :  { %90 = vmatpush.msra.mxu1 %v57_v17 }
  0x20   :  { %91 = vmatpush.msra.mxu1 %v56_v18 }
  0x82   :  { %v49_v20 = vpop.f32.mrf.mxu0 }
  0x83   :  { %v50_v21 = vadd.f32 %v115_v19, %v49_v20 }
  0x85   :  { %v52_v22 = vmul.f32 0.5, %v50_v21 }
  0x87   :  { %117 = vtanh.f32 %v52_v22 }
  0x8d   :  { %v118_v23 = vpop.eup %117 }
  0x8e   :  { %v54_v24 = vmul.f32 0.5, %v118_v23 }
  0x90   :  { %v55_v25 = vadd.f32 0.5, %v54_v24 }
  0x92   :  { %92 = vmatmul.f32.vlgmr.msra.gmra.mxu1 %v55_v25 }
 0x10f   :  { %v93_v27 = vpop.f32.mrf.mxu1 }
 0x110   :  { %v94_v28 = vadd.f32 %v116_v26, %v93_v27 }
 0x112   :  { %96 = vst [vmem:[#allocation2] sm:$0xff] %v94_v28 }
 0x113   :  { %107 = dma.vmem_to_hbm [thread:$0]  %s103_s3, 128, %s105_s9, [#allocation3]  }
 0x114   :  { %143 = dma.done.wait [#allocation3], 128  }
 0x115   :  { %144 = vsyncadd [#allocation3], 4294967168 }
 0x116   :  { %112 = vsyncpa [#allocation3], 1 }

</bundles_post_ra>
